<compile_context>
chip_gen: v7x
topology: tpu7x:2x2x1
jax: 0.10.0
libtpu: 0.0.40
codegen_flags: <defaults>
</compile_context>

<pallas_src>
import functools

import jax
import jax.numpy as jnp
from jax import lax
from jax.experimental import pallas as pl
from jax.experimental.pallas import tpu as pltpu

LANES = 128
SUBLANES = 8
MAX_ROW_TILE = 4096       # 4096 x 128 f32 = 2 MiB per input block
NUM_CORE_SPLITS = 2       # leading "parallel" grid axis for v7x's 2 TensorCores


def _round_up(v, m):
    return ((v + m - 1) // m) * m


def _charbonnier_kernel(x_ref, y_ref, o_ref, *, eps, block_rows,
                        steps_per_split, last_block, valid_rows_last,
                        needs_guard):
    c = pl.program_id(0)   # core split ("parallel")
    i = pl.program_id(1)   # reduction step within this split ("arbitrary")

    @pl.when(i == 0)
    def _():
        o_ref[...] = jnp.zeros_like(o_ref)

    d = x_ref[...].astype(jnp.float32) - y_ref[...].astype(jnp.float32)
    val = jnp.sqrt(d * d + jnp.float32(eps))

    def accum(v):
        # Fold (block_rows, 128) down to one (8, 128) vreg with pure VPU adds
        # over the leading (non-tiled) axis — no XLU, no big-accumulator RMW.
        partial = jnp.sum(v.reshape(block_rows // SUBLANES, SUBLANES, LANES), axis=0)
        o_ref[...] += partial.reshape(1, SUBLANES, LANES)

    if not needs_guard:
        # All blocks are full and every grid step is real: unmasked fast path.
        accum(val)
    else:
        g = c * steps_per_split + i   # global block index

        @pl.when(g < last_block)
        def _():
            accum(val)

        @pl.when(g == last_block)
        def _():
            if valid_rows_last != block_rows:
                # Ragged edge block: out-of-bounds sublanes hold unspecified
                # data; block-local row mask (no int32 overflow possible).
                row_ids = lax.broadcasted_iota(jnp.int32, val.shape, 0)
                accum(jnp.where(row_ids < valid_rows_last, val, jnp.float32(0.0)))
            else:
                accum(val)
        # g > last_block: megacore-padding dummy step -> no accumulate.


def charbonnier_loss2(x, y, eps=1e-6):
    """Pallas TPU implementation of CharbonnierLoss2.forward."""
    assert x.shape == y.shape
    n = x.size
    eps = float(eps)

    xf = x.reshape(-1)
    yf = y.reshape(-1)

    rows = n // LANES
    n_main = rows * LANES
    n_tail = n - n_main

    # <128-element ragged tail handled in plain jnp (avoids a full-tensor
    # jnp.pad copy in HBM just to round up to a lane multiple).
    tail_sum = jnp.float32(0.0)
    if n_tail:
        dt = xf[n_main:].astype(jnp.float32) - yf[n_main:].astype(jnp.float32)
        tail_sum = jnp.sum(jnp.sqrt(dt * dt + jnp.float32(eps)))
        xf = xf[:n_main]
        yf = yf[:n_main]

    if rows == 0:  # degenerate tiny input: everything was tail
        return tail_sum / jnp.float32(n)

    x2d = xf.reshape(rows, LANES)
    y2d = yf.reshape(rows, LANES)

    # Biggest tile that keeps 2 inputs x 2 buffers inside v5e's default scoped
    # VMEM; a multiple of 8 so the in-kernel (..., 8, 128) fold is layout-free.
    # TODO(synk): bump to 8192 rows on v7x (via pltpu.get_tpu_info()) and
    # optionally add pipeline_mode=pl.Buffered(3) on the input specs.
    block_rows = min(MAX_ROW_TILE, _round_up(rows, SUBLANES))
    grid_steps = pl.cdiv(rows, block_rows)
    last_block = grid_steps - 1
    valid_rows_last = rows - last_block * block_rows

    num_splits = NUM_CORE_SPLITS if grid_steps >= NUM_CORE_SPLITS else 1
    steps_per_split = pl.cdiv(grid_steps, num_splits)
    has_dummy = num_splits * steps_per_split > grid_steps
    needs_guard = has_dummy or (valid_rows_last != block_rows)

    def in_index_map(c, i):
        # Clamp so megacore-padding "dummy" steps never index past the array.
        return (jnp.minimum(c * steps_per_split + i, last_block), 0)

    kernel = functools.partial(
        _charbonnier_kernel,
        eps=eps,
        block_rows=block_rows,
        steps_per_split=steps_per_split,
        last_block=last_block,
        valid_rows_last=valid_rows_last,
        needs_guard=needs_guard,
    )

    partials = pl.pallas_call(
        kernel,
        out_shape=jax.ShapeDtypeStruct((num_splits, SUBLANES, LANES), jnp.float32),
        grid_spec=pltpu.PrefetchScalarGridSpec(
            num_scalar_prefetch=0,
            grid=(num_splits, steps_per_split),
            in_specs=[
                pl.BlockSpec((block_rows, LANES), in_index_map),
                pl.BlockSpec((block_rows, LANES), in_index_map),
            ],
            # One (1, 8, 128) partial-sum block per core split; resident across
            # the reduction ("arbitrary") axis -> acts as the accumulator.
            out_specs=pl.BlockSpec((1, SUBLANES, LANES), lambda c, i: (c, 0, 0)),
        ),
        compiler_params=pltpu.CompilerParams(
            dimension_semantics=("parallel", "arbitrary"),
        ),
    )(x2d, y2d)

    # Tiny final reduction (<= 2 x 8 x 128 elements) done in plain XLA.
    return (jnp.sum(partials) + tail_sum) / jnp.float32(n)


if __name__ == "__main__":
    key = jax.random.PRNGKey(0)
    k1, k2, k3, k4 = jax.random.split(key, 4)

    # Main case: NCHW, matching the PyTorch module's typical usage.
    shape = (2, 4, 16, 16)
    x = jax.random.normal(k1, shape, dtype=jnp.float32)
    y = jax.random.normal(k2, shape, dtype=jnp.float32)
    loss = jax.block_until_ready(charbonnier_loss2(x, y, eps=1e-6))
    diff = x - y
    ref = jnp.mean(jnp.sqrt(diff * diff + 1e-6))
    assert jnp.allclose(loss, ref, rtol=1e-5, atol=1e-6), (loss, ref)

    # Ragged case: exercises the <128-element lane tail and the masked edge block.
    shape2 = (3, 5, 7, 9)
    x2 = jax.random.normal(k3, shape2, dtype=jnp.float32)
    y2 = jax.random.normal(k4, shape2, dtype=jnp.float32)
    loss2 = jax.block_until_ready(charbonnier_loss2(x2, y2, eps=1e-6))
    d2 = x2 - y2
    ref2 = jnp.mean(jnp.sqrt(d2 * d2 + 1e-6))
    assert jnp.allclose(loss2, ref2, rtol=1e-5, atol=1e-6), (loss2, ref2)

    print("KERNEL_OK")
</pallas_src>

<mosaic_0001>
module attributes {stable_mosaic.version = 11 : i64} {
  func.func @_charbonnier_kernel(%arg0: i32, %arg1: i32, %arg2: memref<16x128xf32, #tpu.memory_space<vmem>>, %arg3: memref<16x128xf32, #tpu.memory_space<vmem>>, %arg4: memref<1x8x128xf32, #tpu.memory_space<vmem>>) attributes {dimension_semantics = [#tpu.dimension_semantics<parallel>, #tpu.dimension_semantics<arbitrary>], iteration_bounds = array<i64: 1, 1>, scalar_prefetch = 0 : i64, scratch_operands = 0 : i64, tpu.core_type = #tpu.core_type<tc>, window_params = [{transform_indices = @transform_0, window_bounds = array<i64: 16, 128>}, {transform_indices = @transform_1, window_bounds = array<i64: 16, 128>}, {transform_indices = @transform_2, window_bounds = array<i64: 1, 8, 128>}]} {
    %c0_i32 = arith.constant 0 : i32
    %0 = arith.cmpi eq, %arg1, %c0_i32 : i32
    %1 = arith.extui %0 : i1 to i32
    %c0_i32_0 = arith.constant 0 : i32
    %2 = arith.cmpi ne, %1, %c0_i32_0 : i32
    scf.if %2 {
      %cst_11 = arith.constant 0.000000e+00 : f32
      %16 = vector.broadcast %cst_11 : f32 to vector<1x8x128xf32>
      %c0_12 = arith.constant 0 : index
      %c0_13 = arith.constant 0 : index
      %c0_14 = arith.constant 0 : index
      %17 = vector.load %arg4[%c0_12, %c0_13, %c0_14] : memref<1x8x128xf32, #tpu.memory_space<vmem>>, vector<1x8x128xf32>
      tpu.vector_store %arg4[%c0_12, %c0_13, %c0_14], %16 {strides = array<i32>} : memref<1x8x128xf32, #tpu.memory_space<vmem>>, vector<1x8x128xf32>,
    } else {
    }
    %c0 = arith.constant 0 : index
    %c0_1 = arith.constant 0 : index
    %3 = vector.load %arg2[%c0, %c0_1] : memref<16x128xf32, #tpu.memory_space<vmem>>, vector<16x128xf32>
    %c0_2 = arith.constant 0 : index
    %c0_3 = arith.constant 0 : index
    %4 = vector.load %arg3[%c0_2, %c0_3] : memref<16x128xf32, #tpu.memory_space<vmem>>, vector<16x128xf32>
    %5 = arith.subf %3, %4 : vector<16x128xf32>
    %6 = arith.mulf %5, %5 : vector<16x128xf32>
    %cst = arith.constant 9.99999997E-7 : f32
    %7 = vector.broadcast %cst : f32 to vector<16x128xf32>
    %8 = arith.addf %6, %7 : vector<16x128xf32>
    %9 = math.sqrt %8 : vector<16x128xf32>
    %10 = vector.shape_cast %9 : vector<16x128xf32> to vector<2x8x128xf32>
    %cst_4 = arith.constant dense<0.000000e+00> : vector<8x128xf32>
    %11 = vector.multi_reduction <add>, %10, %cst_4 [0] : vector<2x8x128xf32> to vector<8x128xf32>
    %c0_5 = arith.constant 0 : index
    %c0_6 = arith.constant 0 : index
    %c0_7 = arith.constant 0 : index
    %12 = vector.load %arg4[%c0_5, %c0_6, %c0_7] : memref<1x8x128xf32, #tpu.memory_space<vmem>>, vector<1x8x128xf32>
    %13 = vector.shape_cast %11 : vector<8x128xf32> to vector<1x8x128xf32>
    %14 = arith.addf %12, %13 : vector<1x8x128xf32>
    %c0_8 = arith.constant 0 : index
    %c0_9 = arith.constant 0 : index
    %c0_10 = arith.constant 0 : index
    %15 = vector.load %arg4[%c0_8, %c0_9, %c0_10] : memref<1x8x128xf32, #tpu.memory_space<vmem>>, vector<1x8x128xf32>
    tpu.vector_store %arg4[%c0_8, %c0_9, %c0_10], %14 {strides = array<i32>} : memref<1x8x128xf32, #tpu.memory_space<vmem>>, vector<1x8x128xf32>,
    return
  }
  func.func @transform_0(%arg0: i32, %arg1: i32) -> (i32, i32) {
    %c1_i32 = arith.constant 1 : i32
    %0 = arith.muli %arg0, %c1_i32 : i32
    %1 = arith.addi %0, %arg1 : i32
    %c0_i32 = arith.constant 0 : i32
    %2 = arith.minsi %1, %c0_i32 : i32
    %c0_i32_0 = arith.constant 0 : i32
    %c0_i32_1 = arith.constant 0 : i32
    return %2, %c0_i32_0 : i32, i32
  }
  func.func @transform_1(%arg0: i32, %arg1: i32) -> (i32, i32) {
    %c1_i32 = arith.constant 1 : i32
    %0 = arith.muli %arg0, %c1_i32 : i32
    %1 = arith.addi %0, %arg1 : i32
    %c0_i32 = arith.constant 0 : i32
    %2 = arith.minsi %1, %c0_i32 : i32
    %c0_i32_0 = arith.constant 0 : i32
    %c0_i32_1 = arith.constant 0 : i32
    return %2, %c0_i32_0 : i32, i32
  }
  func.func @transform_2(%arg0: i32, %arg1: i32) -> (i32, i32, i32) {
    %c0_i32 = arith.constant 0 : i32
    %c0_i32_0 = arith.constant 0 : i32
    %c0_i32_1 = arith.constant 0 : i32
    return %arg0, %c0_i32, %c0_i32_0 : i32, i32, i32
  }
}

</mosaic_0001>

<bundles_post_ra>
// kernel: tpu_custom_call.1
= control target key start
LH: loop header
LB: loop body
LE: loop exit
PB: predicated region body
PF: predicated region fallthrough
CT: control target
= control target key end

     0   :  { %7 = vsyncpa [#allocation3], 0  ;;  %s251_s0 = inlined_call_operand.hbm [shape: f32[16,128], index: 0, kind: input, shape index: {}]   ;;  %s252_s1 = inlined_call_operand.hbm [shape: f32[16,128], index: 1, kind: input, shape index: {}]   ;;  %s253_s2 = inlined_call_operand.hbm [shape: f32[1,8,128], index: 2, kind: output, shape index: {}]  }
   0x1   :  { %8 = vsyncpa [#allocation6], 0 }
   0x2   :  { %9 = vsyncpa [#allocation4], 0  ;;  %s195_s9 = smov [#allocation2]   ;;  %s123_s13 = scalar_lea.hbm %s251_s0, 256 }
   0x3   :  { %s21_s10 = sshll.u32 %s195_s9, 4  ;;  %p124_p0 = scmp.ne.s32.totalorder %s251_s0, %s123_s13  ;;  %s22_s10 = int_to_ptr.vmem [resolvable:$true] %s21_s10 }
   0x4   :  { %p127_p1 = scmp.lt.u32.totalorder %s123_s13, %s251_s0 }
   0x6   :  { %p129_p2 = pnand %p127_p1, %p124_p0 }
   0x8   :  { %132 = shalt.err (!%p129_p2)
}
   0x9   :  { %s133_s18 = scalar_lea.vmem %s22_s10, 256  ;;  %p138_p4 = scmp.lt.s32.totalorder %s22_s10, %s22_s10 }
   0xa   :  { %p134_p3 = scmp.ne.s32.totalorder %s22_s10, %s133_s18  ;;  %p139_p5 = scmp.lt.s32.totalorder %s133_s18, %s133_s18 }
   0xc   :  { %p140_p6 = por %p139_p5, %p138_p4 }
   0xe   :  { %p141_p7 = pnand %p140_p6, %p134_p3 }
  0x10   :  { %144 = shalt.err (!%p141_p7)
}
  0x11   :  { %s196_s19 = smov 128   ;;  %s197_s20 = smov 8  }
  0x12   :  { %27 = dma.hbm_to_vmem [thread:$0]  %s251_s0, 256, %s22_s10, [#allocation3], %s196_s19, %s196_s19, %s197_s20  }
  0x13   :  { %s198_s23 = smov [#allocation5]   ;;  %s145_s27 = scalar_lea.hbm %s252_s1, 256 }
  0x14   :  { %s39_s24 = sshll.u32 %s198_s23, 4  ;;  %p146_p8 = scmp.ne.s32.totalorder %s252_s1, %s145_s27  ;;  %s40_s24 = int_to_ptr.vmem [resolvable:$true] %s39_s24 }
  0x15   :  { %p149_p9 = scmp.lt.u32.totalorder %s145_s27, %s252_s1 }
  0x17   :  { %p151_p10 = pnand %p149_p9, %p146_p8 }
  0x19   :  { %154 = shalt.err (!%p151_p10)
}
  0x1a   :  { %s155_s4 = scalar_lea.vmem %s40_s24, 256  ;;  %p160_p12 = scmp.lt.s32.totalorder %s40_s24, %s40_s24 }
  0x1b   :  { %p156_p11 = scmp.ne.s32.totalorder %s40_s24, %s155_s4  ;;  %p161_p13 = scmp.lt.s32.totalorder %s155_s4, %s155_s4 }
  0x1d   :  { %p162_p0 = por %p161_p13, %p160_p12 }
  0x1f   :  { %p163_p1 = pnand %p162_p0, %p156_p11 }
  0x21   :  { %166 = shalt.err (!%p163_p1)
}
  0x22   :  { %45 = dma.hbm_to_vmem [thread:$0]  %s252_s1, 256, %s40_s24, [#allocation6], %s196_s19, %s196_s19, %s197_s20  }
  0x23   :  { %189 = dma.done.wait [#allocation3], 256  }
  0x24   :  { %190 = vsyncadd [#allocation3], 4294967040 }
  0x25   :  { %191 = dma.done.wait [#allocation6], 256  }
  0x26   :  { %192 = vsyncadd [#allocation6], 4294967040  ;;  %v65_v0 = vld [vmem:[#allocation2] sm:$0xff]  ;;  %v66_v1 = vld [vmem:[#allocation2 + $0x8] sm:$0xff]  ;;  %s199_s1 = smov [#allocation7]  }
  0x27   :  { %v67_v2 = vld [vmem:[#allocation5] sm:$0xff]  ;;  %v68_v3 = vld [vmem:[#allocation5 + $0x8] sm:$0xff]  ;;  %s99_s6 = sshll.u32 %s199_s1, 4  ;;  %s100_s6 = int_to_ptr.vmem [resolvable:$true] %s99_s6 }
  0x28   :  { %v69_v4 = vsub.f32 %v65_v0, %v67_v2  ;;  %v70_v5 = vsub.f32 %v66_v1, %v68_v3  ;;  %s167_s7 = scalar_lea.vmem %s100_s6, 128  ;;  %p172_p3 = scmp.lt.s32.totalorder %s100_s6, %s100_s6 }
  0x29   :  { %p168_p2 = scmp.ne.s32.totalorder %s100_s6, %s167_s7  ;;  %p173_p4 = scmp.lt.s32.totalorder %s167_s7, %s167_s7 }
  0x2a   :  { %v71_v6 = vmul.f32 %v69_v4, %v69_v4  ;;  %v72_v7 = vmul.f32 %v70_v5, %v70_v5 }
  0x2b   :  { %p174_p5 = por %p173_p4, %p172_p3 }
  0x2c   :  { %v73_v8 = vadd.f32 1e-06, %v71_v6  ;;  %v74_v9 = vadd.f32 1e-06, %v72_v7 }
  0x2d   :  { %p175_p6 = pnand %p174_p5, %p168_p2 }
  0x2e   :  { %119 = vrsqrt.f32 %v73_v8  ;;  %vm77_vm0 = vcmp.eq.f32.partialorder %v73_v8, inf  ;;  %v80_v11 = vand.u32 2147483648, %v73_v8  ;;  %vm79_vm1 = vcmp.eq.f32.partialorder %v73_v8, 0.0 }
  0x2f   :  { %121 = vrsqrt.f32 %v74_v9  ;;  %vm84_vm2 = vcmp.eq.f32.partialorder %v74_v9, inf  ;;  %v87_v14 = vand.u32 2147483648, %v74_v9  ;;  %vm86_vm3 = vcmp.eq.f32.partialorder %v74_v9, 0.0 }
  0x38   :  { %v120_v10 = vpop.eup %119 }
  0x39   :  { %v122_v12 = vpop.eup %121  ;;  %v76_v13 = vmul.f32 %v120_v10, %v73_v8 }
  0x3a   :  { %v83_v15 = vmul.f32 %v122_v12, %v74_v9 }
  0x3b   :  { %v78_v16 = vsel %vm77_vm0, %v73_v8, %v76_v13 }
  0x3c   :  { %v81_v17 = vsel %vm79_vm1, %v80_v11, %v78_v16  ;;  %v85_v18 = vsel %vm84_vm2, %v74_v9, %v83_v15 }
  0x3d   :  { %v88_v19 = vsel %vm86_vm3, %v87_v14, %v85_v18 }
  0x3e   :  { %v89_v20 = vadd.f32 %v88_v19, %v81_v17 }
  0x40   :  { %92 = vst [vmem:[#allocation7] sm:$0xff] %v89_v20 }
  0x41   :  { %178 = shalt.err (!%p175_p6)
}
  0x42   :  { %s179_s10 = scalar_lea.hbm %s253_s2, 128 }
  0x43   :  { %p180_p7 = scmp.ne.s32.totalorder %s253_s2, %s179_s10  ;;  %p183_p8 = scmp.lt.u32.totalorder %s179_s10, %s253_s2 }
  0x45   :  { %p185_p9 = pnand %p183_p8, %p180_p7 }
  0x47   :  { %188 = shalt.err (!%p185_p9)
}
  0x48   :  { %102 = dma.vmem_to_hbm [thread:$0]  %s100_s6, 128, %s253_s2, [#allocation4]  }
  0x49   :  { %193 = dma.done.wait [#allocation4], 128  }
  0x4a   :  { %194 = vsyncadd [#allocation4], 4294967168 }
  0x4b   :  { %106 = vsyncpa [#allocation3], 1 }
  0x4c   :  { %107 = vsyncpa [#allocation6], 1 }
  0x4d   :  { %108 = vsyncpa [#allocation4], 1 }

</bundles_post_ra>
